<compile_context>
chip_gen: v7x
topology: tpu7x:2x2x1
jax: 0.10.0
libtpu: 0.0.40
codegen_flags: <defaults>
</compile_context>

<pallas_src>
import jax
import jax.numpy as jnp
from jax.experimental import pallas as pl
from jax.experimental.pallas import tpu as pltpu


def _basic_block_kernel_small_c(x_ref, w1_ref, b1_ref, w2_ref, b2_ref, o_ref):
    """VPU path for tiny channel counts.

    x_ref / o_ref: (1, C, RT, 128) VMEM tiles -> per-channel (RT, 128) arrays
    are sublane- and lane-dense.  w1 (Cmid, Cin), b1 (Cmid,), w2 (Cout, Cmid),
    b2 (Cout,) live in SMEM and are read as scalars (unrolled FMAs, no MXU).
    """
    cin = x_ref.shape[1]
    cmid = w1_ref.shape[0]
    cout = w2_ref.shape[0]
    x = x_ref[0]                                  # (C, RT, 128) fp32

    # conv1 (1x1) + folded BN1 + ReLU6
    h_rows = []
    for co in range(cmid):
        acc = x[0] * w1_ref[co, 0]
        for ci in range(1, cin):
            acc = acc + x[ci] * w1_ref[co, ci]
        h_rows.append(jnp.clip(acc + b1_ref[co], 0.0, 6.0))

    # conv2 (1x1) + folded BN2, drop_path=Identity, residual add, final ReLU6
    for co in range(cout):
        acc = h_rows[0] * w2_ref[co, 0]
        for ci in range(1, cmid):
            acc = acc + h_rows[ci] * w2_ref[co, ci]
        acc = acc + b2_ref[co] + x[co]
        o_ref[0, co] = jnp.clip(acc, 0.0, 6.0)


def _basic_block_kernel_dot(x_ref, w1_ref, b1_ref, w2_ref, b2_ref, o_ref):
    """MXU path for realistic channel counts (C > threshold).

    x_ref / o_ref: (1, C, TM) tiles, lane axis = spatial (TM % 128 == 0).
    fp32 matmuls with HIGHEST precision to match the fp32 reference.
    """
    x = x_ref[0]                                  # (Cin, TM) fp32
    h = jnp.dot(w1_ref[...], x, preferred_element_type=jnp.float32,
                precision=jax.lax.Precision.HIGHEST) + b1_ref[...]
    h = jnp.clip(h, 0.0, 6.0)
    y = jnp.dot(w2_ref[...], h, preferred_element_type=jnp.float32,
                precision=jax.lax.Precision.HIGHEST) + b2_ref[...]
    y = y + x                                     # residual in fp32
    o_ref[0] = jnp.clip(y, 0.0, 6.0)


def _vmem_budget():
    """Generation-aware VMEM limit (v7x has only 64 MiB physical)."""
    try:
        cap = pltpu.get_tpu_info().vmem_capacity_bytes
    except Exception:
        cap = 128 * 1024 * 1024
    limit = min(int(cap * 3 // 4), 96 * 1024 * 1024)   # v7x: 48 MiB, v5e/v6e: 96 MiB
    return limit


def basic_block_pallas(x_nchw, w1, b1, w2, b2, *, small_c_threshold=16):
    """Fused BasicBlock forward.

    x_nchw: (N, Cin, H, W) fp32.
    w1: (Cmid, Cin), b1: (Cmid,)  -- conv1 with eval-mode BN1 already folded.
    w2: (Cout, Cmid), b2: (Cout,) -- conv2 with eval-mode BN2 already folded.
    Requires Cout == Cin (residual add), as in the PyTorch module.
    """
    N, C, H, W = x_nchw.shape
    cmid, cin = w1.shape
    cout, _ = w2.shape
    assert cin == C and cout == C, "residual add requires in_channels == out_channels"

    hw = H * W
    lane = 128
    vmem_limit = _vmem_budget()
    tile_budget = vmem_limit // 2                  # headroom for compiler scratch

    small_c = max(cin, cmid, cout) <= small_c_threshold

    if small_c:
        # ---- sublane-dense VPU path: (N, C, R, 128) layout -------------------
        hw_pad = pl.cdiv(hw, lane) * lane
        x3d = x_nchw.reshape(N, C, hw)
        if hw_pad != hw:
            # pad only to the next 128 multiple (at most 127 elems per (n, c))
            x3d = jnp.pad(x3d, ((0, 0), (0, 0), (0, hw_pad - hw)))
        R = hw_pad // lane
        x4d = x3d.reshape(N, C, R, lane)

        # VMEM per spatial row of 128 lanes: double-buffered x + out tiles,
        # cmid live intermediates (x2 margin), plus the loaded x copy.
        per_row_bytes = lane * 4 * (2 * cin + 2 * cout + 2 * cmid + cin)
        rt_cap = min(2048, max(8, tile_budget // per_row_bytes))
        if R <= rt_cap:
            rt = R                                  # full dim: always legal
        else:
            rt = (rt_cap // 8) * 8                  # multiple of 8 sublanes
        # keep >= 2 grid steps per chip so both v7x TensorCores get work
        if N == 1 and rt == R and R >= 16:
            rt = max(8, ((pl.cdiv(R, 2) + 7) // 8) * 8)

        grid = (N, pl.cdiv(R, rt))
        x_spec = pl.BlockSpec((1, C, rt, lane), lambda n, s: (n, 0, s, 0))
        o_spec = pl.BlockSpec((1, C, rt, lane), lambda n, s: (n, 0, s, 0))
        smem = pl.BlockSpec(memory_space=pltpu.MemorySpace.SMEM)
        in_specs = [x_spec, smem, smem, smem, smem]
        out_shape = jax.ShapeDtypeStruct((N, C, R, lane), jnp.float32)
        kernel = _basic_block_kernel_small_c
        args = (x4d, w1, b1, w2, b2)
    else:
        # ---- MXU path: (N, C, hw) layout, ragged last block, no host pad -----
        x3d = x_nchw.reshape(N, C, hw)
        weight_bytes = (cmid * cin + cout * cmid + cmid + cout) * 4
        per_lane_bytes = 4 * (2 * cin + 2 * cout + 2 * cmid)
        tm_cap = max(lane, (tile_budget - weight_bytes) // per_lane_bytes)
        if hw <= lane:
            tm = hw
        else:
            tm = min(8192, max(256, (tm_cap // 256) * 256))
            tm = min(tm, (hw // lane) * lane)       # multiple of 128, <= data
            if N == 1 and tm >= hw and hw > 2 * lane:
                tm = max(lane, ((hw // 2) // lane) * lane)   # 2 steps for v7x

        grid = (N, pl.cdiv(hw, tm))
        # If DMA remains exposed, pipeline_mode=pl.Buffered(3) on x_spec is an
        # option (costs one extra input buffer of VMEM).
        x_spec = pl.BlockSpec((1, C, tm), lambda n, s: (n, 0, s))
        o_spec = pl.BlockSpec((1, C, tm), lambda n, s: (n, 0, s))
        in_specs = [
            x_spec,
            pl.BlockSpec((cmid, cin), lambda n, s: (0, 0)),
            pl.BlockSpec((cmid, 1), lambda n, s: (0, 0)),
            pl.BlockSpec((cout, cmid), lambda n, s: (0, 0)),
            pl.BlockSpec((cout, 1), lambda n, s: (0, 0)),
        ]
        out_shape = jax.ShapeDtypeStruct((N, C, hw), jnp.float32)
        kernel = _basic_block_kernel_dot
        args = (x3d, w1, b1.reshape(cmid, 1), w2, b2.reshape(cout, 1))

    out = pl.pallas_call(
        kernel,
        out_shape=out_shape,
        grid_spec=pltpu.PrefetchScalarGridSpec(
            num_scalar_prefetch=0,
            grid=grid,
            in_specs=in_specs,
            out_specs=o_spec,
        ),
        compiler_params=pltpu.CompilerParams(
            dimension_semantics=("parallel", "parallel"),
            vmem_limit_bytes=vmem_limit,
        ),
    )(*args)

    if small_c:
        out = out.reshape(N, C, out.shape[2] * lane)
        if out.shape[2] != hw:
            out = out[:, :, :hw]
    return out.reshape(N, C, H, W)


def fold_bn(w, b, gamma, beta, mean, var, eps=1e-5):
    """Fold eval-mode BatchNorm into a 1x1 conv. w: (Cout, Cin), b: (Cout,)."""
    scale = gamma / jnp.sqrt(var + eps)
    w_f = w * scale[:, None]
    b_f = (b - mean) * scale + beta
    return w_f, b_f


def reference(x_nchw, w1, b1, w2, b2):
    N, C, H, W = x_nchw.shape
    x = x_nchw.reshape(N, C, H * W)
    h = jnp.clip(jnp.einsum('oc,ncm->nom', w1, x) + b1[None, :, None], 0.0, 6.0)
    y = jnp.einsum('oc,ncm->nom', w2, h) + b2[None, :, None] + x
    return jnp.clip(y, 0.0, 6.0).reshape(N, C, H, W)


if __name__ == "__main__":
    # BasicBlock(in_channels=4, out_channels=4); input (N=2, C=4, H=16, W=16)
    in_channels = out_channels = mid_channels = 4
    N, H, W = 2, 16, 16

    key = jax.random.PRNGKey(0)
    keys = jax.random.split(key, 11)

    x = jax.random.normal(keys[0], (N, in_channels, H, W), jnp.float32)

    # 1x1 conv params, torch layout (Cout, Cin) (i.e. weight[:, :, 0, 0])
    w1 = jax.random.normal(keys[1], (mid_channels, in_channels), jnp.float32) * 0.5
    b1 = jax.random.normal(keys[2], (mid_channels,), jnp.float32) * 0.1
    w2 = jax.random.normal(keys[3], (out_channels, mid_channels), jnp.float32) * 0.5
    b2 = jax.random.normal(keys[4], (out_channels,), jnp.float32) * 0.1

    # eval-mode BatchNorm parameters / running stats (deterministic, nontrivial)
    g1 = 1.0 + 0.1 * jax.random.normal(keys[5], (mid_channels,), jnp.float32)
    be1 = 0.1 * jax.random.normal(keys[6], (mid_channels,), jnp.float32)
    m1 = 0.1 * jax.random.normal(keys[7], (mid_channels,), jnp.float32)
    v1 = jnp.abs(1.0 + 0.1 * jax.random.normal(keys[8], (mid_channels,), jnp.float32))
    g2 = 1.0 + 0.1 * jax.random.normal(keys[9], (out_channels,), jnp.float32)
    be2 = 0.1 * jax.random.normal(keys[10], (out_channels,), jnp.float32)
    m2 = jnp.zeros((out_channels,), jnp.float32)
    v2 = jnp.ones((out_channels,), jnp.float32)

    # fold eval-mode BN into the 1x1 convs
    w1f, b1f = fold_bn(w1, b1, g1, be1, m1, v1)
    w2f, b2f = fold_bn(w2, b2, g2, be2, m2, v2)

    out = basic_block_pallas(x, w1f, b1f, w2f, b2f)
    out = jax.block_until_ready(out)

    ref = reference(x, w1f, b1f, w2f, b2f)
    assert out.shape == (N, out_channels, H, W)
    assert jnp.allclose(out, ref, atol=1e-4, rtol=1e-5)

    print("KERNEL_OK")
</pallas_src>

<mosaic_0001>
module attributes {stable_mosaic.version = 11 : i64} {
  func.func @_basic_block_kernel_small_c(%arg0: i32, %arg1: i32, %arg2: memref<1x4x2x128xf32, #tpu.memory_space<vmem>>, %arg3: memref<4x4xf32, #tpu.memory_space<smem>>, %arg4: memref<4xf32, #tpu.memory_space<smem>>, %arg5: memref<4x4xf32, #tpu.memory_space<smem>>, %arg6: memref<4xf32, #tpu.memory_space<smem>>, %arg7: memref<1x4x2x128xf32, #tpu.memory_space<vmem>>) attributes {dimension_semantics = [#tpu.dimension_semantics<parallel>, #tpu.dimension_semantics<parallel>], iteration_bounds = array<i64: 2, 1>, scalar_prefetch = 0 : i64, scratch_operands = 0 : i64, tpu.core_type = #tpu.core_type<tc>, window_params = [{transform_indices = @transform_0, window_bounds = array<i64: 1, 4, 2, 128>}, {transform_indices = @transform_1, window_bounds = array<i64: 4, 4>}, {transform_indices = @transform_2, window_bounds = array<i64: 4>}, {transform_indices = @transform_3, window_bounds = array<i64: 4, 4>}, {transform_indices = @transform_4, window_bounds = array<i64: 4>}, {transform_indices = @transform_5, window_bounds = array<i64: 1, 4, 2, 128>}]} {
    %c0 = arith.constant 0 : index
    %c0_0 = arith.constant 0 : index
    %c0_1 = arith.constant 0 : index
    %c0_2 = arith.constant 0 : index
    %0 = vector.load %arg2[%c0, %c0_0, %c0_1, %c0_2] : memref<1x4x2x128xf32, #tpu.memory_space<vmem>>, vector<1x4x2x128xf32>
    %1 = vector.shape_cast %0 : vector<1x4x2x128xf32> to vector<4x2x128xf32>
    %2 = vector.extract_strided_slice %1 {offsets = [0, 0, 0], sizes = [1, 2, 128], strides = [1, 1, 1]} : vector<4x2x128xf32> to vector<1x2x128xf32>
    %3 = vector.shape_cast %2 : vector<1x2x128xf32> to vector<2x128xf32>
    %c0_3 = arith.constant 0 : index
    %c0_4 = arith.constant 0 : index
    %4 = memref.load %arg3[%c0_3, %c0_4] : memref<4x4xf32, #tpu.memory_space<smem>>
    %5 = vector.broadcast %4 : f32 to vector<2x128xf32>
    %6 = arith.mulf %3, %5 : vector<2x128xf32>
    %7 = vector.extract_strided_slice %1 {offsets = [1, 0, 0], sizes = [1, 2, 128], strides = [1, 1, 1]} : vector<4x2x128xf32> to vector<1x2x128xf32>
    %8 = vector.shape_cast %7 : vector<1x2x128xf32> to vector<2x128xf32>
    %c0_5 = arith.constant 0 : index
    %c1 = arith.constant 1 : index
    %9 = memref.load %arg3[%c0_5, %c1] : memref<4x4xf32, #tpu.memory_space<smem>>
    %10 = vector.broadcast %9 : f32 to vector<2x128xf32>
    %11 = arith.mulf %8, %10 : vector<2x128xf32>
    %12 = arith.addf %6, %11 : vector<2x128xf32>
    %13 = vector.extract_strided_slice %1 {offsets = [2, 0, 0], sizes = [1, 2, 128], strides = [1, 1, 1]} : vector<4x2x128xf32> to vector<1x2x128xf32>
    %14 = vector.shape_cast %13 : vector<1x2x128xf32> to vector<2x128xf32>
    %c0_6 = arith.constant 0 : index
    %c2 = arith.constant 2 : index
    %15 = memref.load %arg3[%c0_6, %c2] : memref<4x4xf32, #tpu.memory_space<smem>>
    %16 = vector.broadcast %15 : f32 to vector<2x128xf32>
    %17 = arith.mulf %14, %16 : vector<2x128xf32>
    %18 = arith.addf %12, %17 : vector<2x128xf32>
    %19 = vector.extract_strided_slice %1 {offsets = [3, 0, 0], sizes = [1, 2, 128], strides = [1, 1, 1]} : vector<4x2x128xf32> to vector<1x2x128xf32>
    %20 = vector.shape_cast %19 : vector<1x2x128xf32> to vector<2x128xf32>
    %c0_7 = arith.constant 0 : index
    %c3 = arith.constant 3 : index
    %21 = memref.load %arg3[%c0_7, %c3] : memref<4x4xf32, #tpu.memory_space<smem>>
    %22 = vector.broadcast %21 : f32 to vector<2x128xf32>
    %23 = arith.mulf %20, %22 : vector<2x128xf32>
    %24 = arith.addf %18, %23 : vector<2x128xf32>
    %c0_8 = arith.constant 0 : index
    %25 = memref.load %arg4[%c0_8] : memref<4xf32, #tpu.memory_space<smem>>
    %26 = vector.broadcast %25 : f32 to vector<2x128xf32>
    %27 = arith.addf %24, %26 : vector<2x128xf32>
    %cst = arith.constant 0.000000e+00 : f32
    %cst_9 = arith.constant 6.000000e+00 : f32
    %28 = vector.broadcast %cst : f32 to vector<2x128xf32>
    %29 = arith.maximumf %28, %27 : vector<2x128xf32>
    %30 = vector.broadcast %cst_9 : f32 to vector<2x128xf32>
    %31 = arith.minimumf %30, %29 : vector<2x128xf32>
    %32 = vector.extract_strided_slice %1 {offsets = [0, 0, 0], sizes = [1, 2, 128], strides = [1, 1, 1]} : vector<4x2x128xf32> to vector<1x2x128xf32>
    %33 = vector.shape_cast %32 : vector<1x2x128xf32> to vector<2x128xf32>
    %c1_10 = arith.constant 1 : index
    %c0_11 = arith.constant 0 : index
    %34 = memref.load %arg3[%c1_10, %c0_11] : memref<4x4xf32, #tpu.memory_space<smem>>
    %35 = vector.broadcast %34 : f32 to vector<2x128xf32>
    %36 = arith.mulf %33, %35 : vector<2x128xf32>
    %37 = vector.extract_strided_slice %1 {offsets = [1, 0, 0], sizes = [1, 2, 128], strides = [1, 1, 1]} : vector<4x2x128xf32> to vector<1x2x128xf32>
    %38 = vector.shape_cast %37 : vector<1x2x128xf32> to vector<2x128xf32>
    %c1_12 = arith.constant 1 : index
    %c1_13 = arith.constant 1 : index
    %39 = memref.load %arg3[%c1_12, %c1_13] : memref<4x4xf32, #tpu.memory_space<smem>>
    %40 = vector.broadcast %39 : f32 to vector<2x128xf32>
    %41 = arith.mulf %38, %40 : vector<2x128xf32>
    %42 = arith.addf %36, %41 : vector<2x128xf32>
    %43 = vector.extract_strided_slice %1 {offsets = [2, 0, 0], sizes = [1, 2, 128], strides = [1, 1, 1]} : vector<4x2x128xf32> to vector<1x2x128xf32>
    %44 = vector.shape_cast %43 : vector<1x2x128xf32> to vector<2x128xf32>
    %c1_14 = arith.constant 1 : index
    %c2_15 = arith.constant 2 : index
    %45 = memref.load %arg3[%c1_14, %c2_15] : memref<4x4xf32, #tpu.memory_space<smem>>
    %46 = vector.broadcast %45 : f32 to vector<2x128xf32>
    %47 = arith.mulf %44, %46 : vector<2x128xf32>
    %48 = arith.addf %42, %47 : vector<2x128xf32>
    %49 = vector.extract_strided_slice %1 {offsets = [3, 0, 0], sizes = [1, 2, 128], strides = [1, 1, 1]} : vector<4x2x128xf32> to vector<1x2x128xf32>
    %50 = vector.shape_cast %49 : vector<1x2x128xf32> to vector<2x128xf32>
    %c1_16 = arith.constant 1 : index
    %c3_17 = arith.constant 3 : index
    %51 = memref.load %arg3[%c1_16, %c3_17] : memref<4x4xf32, #tpu.memory_space<smem>>
    %52 = vector.broadcast %51 : f32 to vector<2x128xf32>
    %53 = arith.mulf %50, %52 : vector<2x128xf32>
    %54 = arith.addf %48, %53 : vector<2x128xf32>
    %c1_18 = arith.constant 1 : index
    %55 = memref.load %arg4[%c1_18] : memref<4xf32, #tpu.memory_space<smem>>
    %56 = vector.broadcast %55 : f32 to vector<2x128xf32>
    %57 = arith.addf %54, %56 : vector<2x128xf32>
    %cst_19 = arith.constant 0.000000e+00 : f32
    %cst_20 = arith.constant 6.000000e+00 : f32
    %58 = vector.broadcast %cst_19 : f32 to vector<2x128xf32>
    %59 = arith.maximumf %58, %57 : vector<2x128xf32>
    %60 = vector.broadcast %cst_20 : f32 to vector<2x128xf32>
    %61 = arith.minimumf %60, %59 : vector<2x128xf32>
    %62 = vector.extract_strided_slice %1 {offsets = [0, 0, 0], sizes = [1, 2, 128], strides = [1, 1, 1]} : vector<4x2x128xf32> to vector<1x2x128xf32>
    %63 = vector.shape_cast %62 : vector<1x2x128xf32> to vector<2x128xf32>
    %c2_21 = arith.constant 2 : index
    %c0_22 = arith.constant 0 : index
    %64 = memref.load %arg3[%c2_21, %c0_22] : memref<4x4xf32, #tpu.memory_space<smem>>
    %65 = vector.broadcast %64 : f32 to vector<2x128xf32>
    %66 = arith.mulf %63, %65 : vector<2x128xf32>
    %67 = vector.extract_strided_slice %1 {offsets = [1, 0, 0], sizes = [1, 2, 128], strides = [1, 1, 1]} : vector<4x2x128xf32> to vector<1x2x128xf32>
    %68 = vector.shape_cast %67 : vector<1x2x128xf32> to vector<2x128xf32>
    %c2_23 = arith.constant 2 : index
    %c1_24 = arith.constant 1 : index
    %69 = memref.load %arg3[%c2_23, %c1_24] : memref<4x4xf32, #tpu.memory_space<smem>>
    %70 = vector.broadcast %69 : f32 to vector<2x128xf32>
    %71 = arith.mulf %68, %70 : vector<2x128xf32>
    %72 = arith.addf %66, %71 : vector<2x128xf32>
    %73 = vector.extract_strided_slice %1 {offsets = [2, 0, 0], sizes = [1, 2, 128], strides = [1, 1, 1]} : vector<4x2x128xf32> to vector<1x2x128xf32>
    %74 = vector.shape_cast %73 : vector<1x2x128xf32> to vector<2x128xf32>
    %c2_25 = arith.constant 2 : index
    %c2_26 = arith.constant 2 : index
    %75 = memref.load %arg3[%c2_25, %c2_26] : memref<4x4xf32, #tpu.memory_space<smem>>
    %76 = vector.broadcast %75 : f32 to vector<2x128xf32>
    %77 = arith.mulf %74, %76 : vector<2x128xf32>
    %78 = arith.addf %72, %77 : vector<2x128xf32>
    %79 = vector.extract_strided_slice %1 {offsets = [3, 0, 0], sizes = [1, 2, 128], strides = [1, 1, 1]} : vector<4x2x128xf32> to vector<1x2x128xf32>
    %80 = vector.shape_cast %79 : vector<1x2x128xf32> to vector<2x128xf32>
    %c2_27 = arith.constant 2 : index
    %c3_28 = arith.constant 3 : index
    %81 = memref.load %arg3[%c2_27, %c3_28] : memref<4x4xf32, #tpu.memory_space<smem>>
    %82 = vector.broadcast %81 : f32 to vector<2x128xf32>
    %83 = arith.mulf %80, %82 : vector<2x128xf32>
    %84 = arith.addf %78, %83 : vector<2x128xf32>
    %c2_29 = arith.constant 2 : index
    %85 = memref.load %arg4[%c2_29] : memref<4xf32, #tpu.memory_space<smem>>
    %86 = vector.broadcast %85 : f32 to vector<2x128xf32>
    %87 = arith.addf %84, %86 : vector<2x128xf32>
    %cst_30 = arith.constant 0.000000e+00 : f32
    %cst_31 = arith.constant 6.000000e+00 : f32
    %88 = vector.broadcast %cst_30 : f32 to vector<2x128xf32>
    %89 = arith.maximumf %88, %87 : vector<2x128xf32>
    %90 = vector.broadcast %cst_31 : f32 to vector<2x128xf32>
    %91 = arith.minimumf %90, %89 : vector<2x128xf32>
    %92 = vector.extract_strided_slice %1 {offsets = [0, 0, 0], sizes = [1, 2, 128], strides = [1, 1, 1]} : vector<4x2x128xf32> to vector<1x2x128xf32>
    %93 = vector.shape_cast %92 : vector<1x2x128xf32> to vector<2x128xf32>
    %c3_32 = arith.constant 3 : index
    %c0_33 = arith.constant 0 : index
    %94 = memref.load %arg3[%c3_32, %c0_33] : memref<4x4xf32, #tpu.memory_space<smem>>
    %95 = vector.broadcast %94 : f32 to vector<2x128xf32>
    %96 = arith.mulf %93, %95 : vector<2x128xf32>
    %97 = vector.extract_strided_slice %1 {offsets = [1, 0, 0], sizes = [1, 2, 128], strides = [1, 1, 1]} : vector<4x2x128xf32> to vector<1x2x128xf32>
    %98 = vector.shape_cast %97 : vector<1x2x128xf32> to vector<2x128xf32>
    %c3_34 = arith.constant 3 : index
    %c1_35 = arith.constant 1 : index
    %99 = memref.load %arg3[%c3_34, %c1_35] : memref<4x4xf32, #tpu.memory_space<smem>>
    %100 = vector.broadcast %99 : f32 to vector<2x128xf32>
    %101 = arith.mulf %98, %100 : vector<2x128xf32>
    %102 = arith.addf %96, %101 : vector<2x128xf32>
    %103 = vector.extract_strided_slice %1 {offsets = [2, 0, 0], sizes = [1, 2, 128], strides = [1, 1, 1]} : vector<4x2x128xf32> to vector<1x2x128xf32>
    %104 = vector.shape_cast %103 : vector<1x2x128xf32> to vector<2x128xf32>
    %c3_36 = arith.constant 3 : index
    %c2_37 = arith.constant 2 : index
    %105 = memref.load %arg3[%c3_36, %c2_37] : memref<4x4xf32, #tpu.memory_space<smem>>
    %106 = vector.broadcast %105 : f32 to vector<2x128xf32>
    %107 = arith.mulf %104, %106 : vector<2x128xf32>
    %108 = arith.addf %102, %107 : vector<2x128xf32>
    %109 = vector.extract_strided_slice %1 {offsets = [3, 0, 0], sizes = [1, 2, 128], strides = [1, 1, 1]} : vector<4x2x128xf32> to vector<1x2x128xf32>
    %110 = vector.shape_cast %109 : vector<1x2x128xf32> to vector<2x128xf32>
    %c3_38 = arith.constant 3 : index
    %c3_39 = arith.constant 3 : index
    %111 = memref.load %arg3[%c3_38, %c3_39] : memref<4x4xf32, #tpu.memory_space<smem>>
    %112 = vector.broadcast %111 : f32 to vector<2x128xf32>
    %113 = arith.mulf %110, %112 : vector<2x128xf32>
    %114 = arith.addf %108, %113 : vector<2x128xf32>
    %c3_40 = arith.constant 3 : index
    %115 = memref.load %arg4[%c3_40] : memref<4xf32, #tpu.memory_space<smem>>
    %116 = vector.broadcast %115 : f32 to vector<2x128xf32>
    %117 = arith.addf %114, %116 : vector<2x128xf32>
    %cst_41 = arith.constant 0.000000e+00 : f32
    %cst_42 = arith.constant 6.000000e+00 : f32
    %118 = vector.broadcast %cst_41 : f32 to vector<2x128xf32>
    %119 = arith.maximumf %118, %117 : vector<2x128xf32>
    %120 = vector.broadcast %cst_42 : f32 to vector<2x128xf32>
    %121 = arith.minimumf %120, %119 : vector<2x128xf32>
    %c0_43 = arith.constant 0 : index
    %c0_44 = arith.constant 0 : index
    %122 = memref.load %arg5[%c0_43, %c0_44] : memref<4x4xf32, #tpu.memory_space<smem>>
    %123 = vector.broadcast %122 : f32 to vector<2x128xf32>
    %124 = arith.mulf %31, %123 : vector<2x128xf32>
    %c0_45 = arith.constant 0 : index
    %c1_46 = arith.constant 1 : index
    %125 = memref.load %arg5[%c0_45, %c1_46] : memref<4x4xf32, #tpu.memory_space<smem>>
    %126 = vector.broadcast %125 : f32 to vector<2x128xf32>
    %127 = arith.mulf %61, %126 : vector<2x128xf32>
    %128 = arith.addf %124, %127 : vector<2x128xf32>
    %c0_47 = arith.constant 0 : index
    %c2_48 = arith.constant 2 : index
    %129 = memref.load %arg5[%c0_47, %c2_48] : memref<4x4xf32, #tpu.memory_space<smem>>
    %130 = vector.broadcast %129 : f32 to vector<2x128xf32>
    %131 = arith.mulf %91, %130 : vector<2x128xf32>
    %132 = arith.addf %128, %131 : vector<2x128xf32>
    %c0_49 = arith.constant 0 : index
    %c3_50 = arith.constant 3 : index
    %133 = memref.load %arg5[%c0_49, %c3_50] : memref<4x4xf32, #tpu.memory_space<smem>>
    %134 = vector.broadcast %133 : f32 to vector<2x128xf32>
    %135 = arith.mulf %121, %134 : vector<2x128xf32>
    %136 = arith.addf %132, %135 : vector<2x128xf32>
    %c0_51 = arith.constant 0 : index
    %137 = memref.load %arg6[%c0_51] : memref<4xf32, #tpu.memory_space<smem>>
    %138 = vector.broadcast %137 : f32 to vector<2x128xf32>
    %139 = arith.addf %136, %138 : vector<2x128xf32>
    %140 = vector.extract_strided_slice %1 {offsets = [0, 0, 0], sizes = [1, 2, 128], strides = [1, 1, 1]} : vector<4x2x128xf32> to vector<1x2x128xf32>
    %141 = vector.shape_cast %140 : vector<1x2x128xf32> to vector<2x128xf32>
    %142 = arith.addf %139, %141 : vector<2x128xf32>
    %cst_52 = arith.constant 0.000000e+00 : f32
    %cst_53 = arith.constant 6.000000e+00 : f32
    %143 = vector.broadcast %cst_52 : f32 to vector<2x128xf32>
    %144 = arith.maximumf %143, %142 : vector<2x128xf32>
    %145 = vector.broadcast %cst_53 : f32 to vector<2x128xf32>
    %146 = arith.minimumf %145, %144 : vector<2x128xf32>
    %c0_54 = arith.constant 0 : index
    %c0_55 = arith.constant 0 : index
    %c0_56 = arith.constant 0 : index
    %c0_57 = arith.constant 0 : index
    %147 = vector.load %arg7[%c0_54, %c0_55, %c0_56, %c0_57] : memref<1x4x2x128xf32, #tpu.memory_space<vmem>>, vector<1x1x2x128xf32>
    %148 = vector.shape_cast %147 : vector<1x1x2x128xf32> to vector<2x128xf32>
    %149 = vector.shape_cast %146 : vector<2x128xf32> to vector<1x1x2x128xf32>
    tpu.vector_store %arg7[%c0_54, %c0_55, %c0_56, %c0_57], %149 {strides = array<i32>} : memref<1x4x2x128xf32, #tpu.memory_space<vmem>>, vector<1x1x2x128xf32>,
    %c1_58 = arith.constant 1 : index
    %c0_59 = arith.constant 0 : index
    %150 = memref.load %arg5[%c1_58, %c0_59] : memref<4x4xf32, #tpu.memory_space<smem>>
    %151 = vector.broadcast %150 : f32 to vector<2x128xf32>
    %152 = arith.mulf %31, %151 : vector<2x128xf32>
    %c1_60 = arith.constant 1 : index
    %c1_61 = arith.constant 1 : index
    %153 = memref.load %arg5[%c1_60, %c1_61] : memref<4x4xf32, #tpu.memory_space<smem>>
    %154 = vector.broadcast %153 : f32 to vector<2x128xf32>
    %155 = arith.mulf %61, %154 : vector<2x128xf32>
    %156 = arith.addf %152, %155 : vector<2x128xf32>
    %c1_62 = arith.constant 1 : index
    %c2_63 = arith.constant 2 : index
    %157 = memref.load %arg5[%c1_62, %c2_63] : memref<4x4xf32, #tpu.memory_space<smem>>
    %158 = vector.broadcast %157 : f32 to vector<2x128xf32>
    %159 = arith.mulf %91, %158 : vector<2x128xf32>
    %160 = arith.addf %156, %159 : vector<2x128xf32>
    %c1_64 = arith.constant 1 : index
    %c3_65 = arith.constant 3 : index
    %161 = memref.load %arg5[%c1_64, %c3_65] : memref<4x4xf32, #tpu.memory_space<smem>>
    %162 = vector.broadcast %161 : f32 to vector<2x128xf32>
    %163 = arith.mulf %121, %162 : vector<2x128xf32>
    %164 = arith.addf %160, %163 : vector<2x128xf32>
    %c1_66 = arith.constant 1 : index
    %165 = memref.load %arg6[%c1_66] : memref<4xf32, #tpu.memory_space<smem>>
    %166 = vector.broadcast %165 : f32 to vector<2x128xf32>
    %167 = arith.addf %164, %166 : vector<2x128xf32>
    %168 = vector.extract_strided_slice %1 {offsets = [1, 0, 0], sizes = [1, 2, 128], strides = [1, 1, 1]} : vector<4x2x128xf32> to vector<1x2x128xf32>
    %169 = vector.shape_cast %168 : vector<1x2x128xf32> to vector<2x128xf32>
    %170 = arith.addf %167, %169 : vector<2x128xf32>
    %cst_67 = arith.constant 0.000000e+00 : f32
    %cst_68 = arith.constant 6.000000e+00 : f32
    %171 = vector.broadcast %cst_67 : f32 to vector<2x128xf32>
    %172 = arith.maximumf %171, %170 : vector<2x128xf32>
    %173 = vector.broadcast %cst_68 : f32 to vector<2x128xf32>
    %174 = arith.minimumf %173, %172 : vector<2x128xf32>
    %c0_69 = arith.constant 0 : index
    %c1_70 = arith.constant 1 : index
    %c0_71 = arith.constant 0 : index
    %c0_72 = arith.constant 0 : index
    %175 = vector.load %arg7[%c0_69, %c1_70, %c0_71, %c0_72] : memref<1x4x2x128xf32, #tpu.memory_space<vmem>>, vector<1x1x2x128xf32>
    %176 = vector.shape_cast %175 : vector<1x1x2x128xf32> to vector<2x128xf32>
    %177 = vector.shape_cast %174 : vector<2x128xf32> to vector<1x1x2x128xf32>
    tpu.vector_store %arg7[%c0_69, %c1_70, %c0_71, %c0_72], %177 {strides = array<i32>} : memref<1x4x2x128xf32, #tpu.memory_space<vmem>>, vector<1x1x2x128xf32>,
    %c2_73 = arith.constant 2 : index
    %c0_74 = arith.constant 0 : index
    %178 = memref.load %arg5[%c2_73, %c0_74] : memref<4x4xf32, #tpu.memory_space<smem>>
    %179 = vector.broadcast %178 : f32 to vector<2x128xf32>
    %180 = arith.mulf %31, %179 : vector<2x128xf32>
    %c2_75 = arith.constant 2 : index
    %c1_76 = arith.constant 1 : index
    %181 = memref.load %arg5[%c2_75, %c1_76] : memref<4x4xf32, #tpu.memory_space<smem>>
    %182 = vector.broadcast %181 : f32 to vector<2x128xf32>
    %183 = arith.mulf %61, %182 : vector<2x128xf32>
    %184 = arith.addf %180, %183 : vector<2x128xf32>
    %c2_77 = arith.constant 2 : index
    %c2_78 = arith.constant 2 : index
    %185 = memref.load %arg5[%c2_77, %c2_78] : memref<4x4xf32, #tpu.memory_space<smem>>
    %186 = vector.broadcast %185 : f32 to vector<2x128xf32>
    %187 = arith.mulf %91, %186 : vector<2x128xf32>
    %188 = arith.addf %184, %187 : vector<2x128xf32>
    %c2_79 = arith.constant 2 : index
    %c3_80 = arith.constant 3 : index
    %189 = memref.load %arg5[%c2_79, %c3_80] : memref<4x4xf32, #tpu.memory_space<smem>>
    %190 = vector.broadcast %189 : f32 to vector<2x128xf32>
    %191 = arith.mulf %121, %190 : vector<2x128xf32>
    %192 = arith.addf %188, %191 : vector<2x128xf32>
    %c2_81 = arith.constant 2 : index
    %193 = memref.load %arg6[%c2_81] : memref<4xf32, #tpu.memory_space<smem>>
    %194 = vector.broadcast %193 : f32 to vector<2x128xf32>
    %195 = arith.addf %192, %194 : vector<2x128xf32>
    %196 = vector.extract_strided_slice %1 {offsets = [2, 0, 0], sizes = [1, 2, 128], strides = [1, 1, 1]} : vector<4x2x128xf32> to vector<1x2x128xf32>
    %197 = vector.shape_cast %196 : vector<1x2x128xf32> to vector<2x128xf32>
    %198 = arith.addf %195, %197 : vector<2x128xf32>
    %cst_82 = arith.constant 0.000000e+00 : f32
    %cst_83 = arith.constant 6.000000e+00 : f32
    %199 = vector.broadcast %cst_82 : f32 to vector<2x128xf32>
    %200 = arith.maximumf %199, %198 : vector<2x128xf32>
    %201 = vector.broadcast %cst_83 : f32 to vector<2x128xf32>
    %202 = arith.minimumf %201, %200 : vector<2x128xf32>
    %c0_84 = arith.constant 0 : index
    %c2_85 = arith.constant 2 : index
    %c0_86 = arith.constant 0 : index
    %c0_87 = arith.constant 0 : index
    %203 = vector.load %arg7[%c0_84, %c2_85, %c0_86, %c0_87] : memref<1x4x2x128xf32, #tpu.memory_space<vmem>>, vector<1x1x2x128xf32>
    %204 = vector.shape_cast %203 : vector<1x1x2x128xf32> to vector<2x128xf32>
    %205 = vector.shape_cast %202 : vector<2x128xf32> to vector<1x1x2x128xf32>
    tpu.vector_store %arg7[%c0_84, %c2_85, %c0_86, %c0_87], %205 {strides = array<i32>} : memref<1x4x2x128xf32, #tpu.memory_space<vmem>>, vector<1x1x2x128xf32>,
    %c3_88 = arith.constant 3 : index
    %c0_89 = arith.constant 0 : index
    %206 = memref.load %arg5[%c3_88, %c0_89] : memref<4x4xf32, #tpu.memory_space<smem>>
    %207 = vector.broadcast %206 : f32 to vector<2x128xf32>
    %208 = arith.mulf %31, %207 : vector<2x128xf32>
    %c3_90 = arith.constant 3 : index
    %c1_91 = arith.constant 1 : index
    %209 = memref.load %arg5[%c3_90, %c1_91] : memref<4x4xf32, #tpu.memory_space<smem>>
    %210 = vector.broadcast %209 : f32 to vector<2x128xf32>
    %211 = arith.mulf %61, %210 : vector<2x128xf32>
    %212 = arith.addf %208, %211 : vector<2x128xf32>
    %c3_92 = arith.constant 3 : index
    %c2_93 = arith.constant 2 : index
    %213 = memref.load %arg5[%c3_92, %c2_93] : memref<4x4xf32, #tpu.memory_space<smem>>
    %214 = vector.broadcast %213 : f32 to vector<2x128xf32>
    %215 = arith.mulf %91, %214 : vector<2x128xf32>
    %216 = arith.addf %212, %215 : vector<2x128xf32>
    %c3_94 = arith.constant 3 : index
    %c3_95 = arith.constant 3 : index
    %217 = memref.load %arg5[%c3_94, %c3_95] : memref<4x4xf32, #tpu.memory_space<smem>>
    %218 = vector.broadcast %217 : f32 to vector<2x128xf32>
    %219 = arith.mulf %121, %218 : vector<2x128xf32>
    %220 = arith.addf %216, %219 : vector<2x128xf32>
    %c3_96 = arith.constant 3 : index
    %221 = memref.load %arg6[%c3_96] : memref<4xf32, #tpu.memory_space<smem>>
    %222 = vector.broadcast %221 : f32 to vector<2x128xf32>
    %223 = arith.addf %220, %222 : vector<2x128xf32>
    %224 = vector.extract_strided_slice %1 {offsets = [3, 0, 0], sizes = [1, 2, 128], strides = [1, 1, 1]} : vector<4x2x128xf32> to vector<1x2x128xf32>
    %225 = vector.shape_cast %224 : vector<1x2x128xf32> to vector<2x128xf32>
    %226 = arith.addf %223, %225 : vector<2x128xf32>
    %cst_97 = arith.constant 0.000000e+00 : f32
    %cst_98 = arith.constant 6.000000e+00 : f32
    %227 = vector.broadcast %cst_97 : f32 to vector<2x128xf32>
    %228 = arith.maximumf %227, %226 : vector<2x128xf32>
    %229 = vector.broadcast %cst_98 : f32 to vector<2x128xf32>
    %230 = arith.minimumf %229, %228 : vector<2x128xf32>
    %c0_99 = arith.constant 0 : index
    %c3_100 = arith.constant 3 : index
    %c0_101 = arith.constant 0 : index
    %c0_102 = arith.constant 0 : index
    %231 = vector.load %arg7[%c0_99, %c3_100, %c0_101, %c0_102] : memref<1x4x2x128xf32, #tpu.memory_space<vmem>>, vector<1x1x2x128xf32>
    %232 = vector.shape_cast %231 : vector<1x1x2x128xf32> to vector<2x128xf32>
    %233 = vector.shape_cast %230 : vector<2x128xf32> to vector<1x1x2x128xf32>
    tpu.vector_store %arg7[%c0_99, %c3_100, %c0_101, %c0_102], %233 {strides = array<i32>} : memref<1x4x2x128xf32, #tpu.memory_space<vmem>>, vector<1x1x2x128xf32>,
    return
  }
  func.func @transform_0(%arg0: i32, %arg1: i32) -> (i32, i32, i32, i32) {
    %c0_i32 = arith.constant 0 : i32
    %c0_i32_0 = arith.constant 0 : i32
    %c0_i32_1 = arith.constant 0 : i32
    return %arg0, %c0_i32, %arg1, %c0_i32_0 : i32, i32, i32, i32
  }
  func.func @transform_1(%arg0: i32, %arg1: i32) -> (i32, i32) {
    %c0_i32 = arith.constant 0 : i32
    %c0_i32_0 = arith.constant 0 : i32
    %c0_i32_1 = arith.constant 0 : i32
    return %c0_i32, %c0_i32_0 : i32, i32
  }
  func.func @transform_2(%arg0: i32, %arg1: i32) -> i32 {
    %c0_i32 = arith.constant 0 : i32
    %c0_i32_0 = arith.constant 0 : i32
    return %c0_i32 : i32
  }
  func.func @transform_3(%arg0: i32, %arg1: i32) -> (i32, i32) {
    %c0_i32 = arith.constant 0 : i32
    %c0_i32_0 = arith.constant 0 : i32
    %c0_i32_1 = arith.constant 0 : i32
    return %c0_i32, %c0_i32_0 : i32, i32
  }
  func.func @transform_4(%arg0: i32, %arg1: i32) -> i32 {
    %c0_i32 = arith.constant 0 : i32
    %c0_i32_0 = arith.constant 0 : i32
    return %c0_i32 : i32
  }
  func.func @transform_5(%arg0: i32, %arg1: i32) -> (i32, i32, i32, i32) {
    %c0_i32 = arith.constant 0 : i32
    %c0_i32_0 = arith.constant 0 : i32
    %c0_i32_1 = arith.constant 0 : i32
    return %arg0, %c0_i32, %arg1, %c0_i32_0 : i32, i32, i32, i32
  }
}

</mosaic_0001>

<bundles_post_ra>
// kernel: tpu_custom_call.1
= control target key start
LH: loop header
LB: loop body
LE: loop exit
PB: predicated region body
PF: predicated region fallthrough
CT: control target
= control target key end

     0   :  { %s1417_s0 = inlined_call_operand.hbm [shape: f32[2,4,2,128], index: 0, kind: input, shape index: {}]   ;;  %s1418_s1 = inlined_call_operand.hbm [shape: f32[4,4], index: 1, kind: input, shape index: {}]   ;;  %s1419_s2 = inlined_call_operand.hbm [shape: f32[4], index: 2, kind: input, shape index: {}]   ;;  %s1420_s3 = inlined_call_operand.hbm [shape: f32[4,4], index: 3, kind: input, shape index: {}]   ;;  %s1421_s4 = inlined_call_operand.hbm [shape: f32[4], index: 4, kind: input, shape index: {}]   ;;  %s1422_s5 = inlined_call_operand.hbm [shape: f32[2,4,2,128], index: 5, kind: output, shape index: {}]  }
   0x1   :  { %1428 = sst [smem:[#allocation18_spill]] %s1417_s0 }
   0x2   :  { %1429 = sst [smem:[#allocation19_spill]] %s1418_s1 }
   0x3   :  { %10 = vsyncpa [#allocation3], 0 }
   0x4   :  { %12 = vsyncpa [#allocation3 + $0x1], 0 }
   0x5   :  { %13 = vsyncpa [#allocation5], 0 }
   0x6   :  { %14 = vsyncpa [#allocation8], 0 }
   0x7   :  { %15 = vsyncpa [#allocation11], 0 }
   0x8   :  { %16 = vsyncpa [#allocation4], 0 }
   0x9   :  { %18 = vsyncpa [#allocation4 + $0x1], 0  ;;  %s1009_s18 = smov 0   ;;  %s1011_s19 = smov 0  }
   0xa   :  { %s1013_s20 = smov 0   ;;  %s1015_s21 = smov 0  }
   0xb   :  { %s1017_s22 = smov 0   ;;  %s1019_s23 = smov 0  }
   0xc LB: > { %s620_s24 = sadd.s32 4294967295, %s967_s23   ;;  %s621_s25 = sadd.s32 4294967294, %s967_s23   ;;  %s967_s23 = sphi %s1019_s23, %s24_s23   ;;  %s963_s22 = sphi %s1017_s22, %s1450_s22   ;;  %s959_s21 = sphi %s1015_s21, %s1449_s21   ;;  %s955_s20 = sphi %s1013_s20, %s1448_s20   ;;  %s951_s19 = sphi %s1011_s19, %s1447_s19   ;;  %s947_s18 = sphi %s1009_s18, %s1446_s18  }
   0xd   : > { %p58_p0 = scmp.ne.s32.totalorder %s951_s19, %s947_s18  ;;  %p1043_p1 = scmp.eq.s32.totalorder %s620_s24, 0 }
   0xe   : > { %p1047_p2 = scmp.eq.s32.totalorder %s620_s24, 1  ;;  %p174_p3 = scmp.eq.s32.totalorder %s621_s25, 1 }
   0xf   : > { %s1430_s26 = scalar_select %p1043_p1, 1, 0 }
  0x10   : > { %p1053_p4 = por %p1043_p1, %p58_p0  ;;  %p622_p5 = scmp.ge.s32.totalorder %s967_s23, 1 }
  0x11   : > { %p1058_p6 = por %p174_p3, %p58_p0  ;;  %p181_p7 = scmp.lt.s32.totalorder %s967_s23, 3 }
  0x12   : > { %s1432_s28 = scalar_select %p1053_p4, 1, 0 }
  0x13   : > { %s1433_s29 = scalar_select %p1058_p6, 1, 0 }
  0x14   : > { %p1063_p8 = pnand %p622_p5, %p181_p7  ;;  %s791_s9 = scalar_lea.hbm %s1419_s2, 16 }
  0x15   : > { %p792_p12 = scmp.ne.s32.totalorder %s1419_s2, %s791_s9  ;;  %p798_p5 = scmp.lt.u32.totalorder %s791_s9, %s1419_s2 }
  0x16   : > { %p704_p10 = pneg %p1063_p8 }
  0x18   : > { %p1072_p11 = pnand %p704_p10, %p1043_p1 }
  0x1a   : > { %p793_p13 = pneg %p1072_p11 }
  0x1c   : > { %p794_p0 = pnand %p793_p13, %p792_p12 }
  0x1e   : > { %p795_p3 = pneg %p794_p0 }
  0x20   : > { %p800_p7 = pnand %p798_p5, %p795_p3 }
  0x22   : > { %803 = shalt.err (!%p800_p7)
}
  0x23   : > { %s969_s14 = smov [#allocation7]   ;;  %s1436_s1 = sld [smem:[#allocation19_spill]] }
  0x24   : > { %710 = dma.hbm_to_smem (!%p1072_p11), %s1419_s2, 16, %s969_s14, [#allocation8]  }
  0x29   : > { %s804_s25 = scalar_lea.hbm %s1436_s1, 64 }
  0x2a   : > { %p805_p10 = scmp.ne.s32.totalorder %s1436_s1, %s804_s25  ;;  %p811_p3 = scmp.lt.u32.totalorder %s804_s25, %s1436_s1 }
  0x2c   : > { %p807_p12 = pnand %p805_p10, %p793_p13 }
  0x2e   : > { %p808_p0 = pneg %p807_p12 }
  0x30   : > { %p813_p5 = pnand %p811_p3, %p808_p0 }
  0x32   : > { %816 = shalt.err (!%p813_p5)
}
  0x33   : > { %s970_s11 = smov [#allocation6]   ;;  %s817_s16 = scalar_lea.hbm %s1420_s3, 64 }
  0x34   : > { %707 = dma.hbm_to_smem (!%p1072_p11), %s1436_s1, 64, %s970_s11, [#allocation5]  }
  0x35   : > { %p818_p7 = scmp.ne.s32.totalorder %s1420_s3, %s817_s16  ;;  %p824_p0 = scmp.lt.u32.totalorder %s817_s16, %s1420_s3 }
  0x37   : > { %p820_p10 = pnand %p818_p7, %p793_p13 }
  0x39   : > { %p821_p12 = pneg %p820_p10 }
  0x3b   : > { %p826_p3 = pnand %p824_p0, %p821_p12 }
  0x3d   : > { %829 = shalt.err (!%p826_p3)
}
  0x3e   : > { %s971_s8 = smov [#allocation9]   ;;  %s830_s13 = scalar_lea.hbm %s1421_s4, 16 }
  0x3f   : > { %713 = dma.hbm_to_smem (!%p1072_p11), %s1420_s3, 64, %s971_s8, [#allocation8]  }
  0x40   : > { %p831_p5 = scmp.ne.s32.totalorder %s1421_s4, %s830_s13  ;;  %p837_p12 = scmp.lt.u32.totalorder %s830_s13, %s1421_s4 }
  0x42   : > { %p833_p7 = pnand %p831_p5, %p793_p13 }
  0x44   : > { %p834_p10 = pneg %p833_p7 }
  0x46   : > { %p839_p0 = pnand %p837_p12, %p834_p10 }
  0x48   : > { %842 = shalt.err (!%p839_p0)
}
  0x49   : > { %s972_s24 = smov [#allocation10]   ;;  %s36_s8 = sadd.s32 1, %s963_s22 }
  0x4a   : > { %716 = dma.hbm_to_smem (!%p1072_p11), %s1421_s4, 16, %s972_s24, [#allocation11]  }
  0x4b   : > { %s45_s9 = sadd.s32 1, %s955_s20  ;;  %p38_p13 = scmp.ge.s32.totalorder %s36_s8, 2 }
  0x4c   : > { %p52_p3 = scmp.ne.s32.totalorder %s955_s20, %s951_s19  ;;  %p53_p5 = scmp.eq.s32.totalorder %s967_s23, 0 }
  0x4d   : > { %p729_p7 = scmp.lt.s32.totalorder %s967_s23, 2  ;;  %s1452_s8 = smov (%p38_p13, %s36_s8), 0 }
  0x4e   : > { %p54_p10 = por %p53_p5, %p52_p3  ;;  %p1156_p12 = por %p1047_p2, %p52_p3 }
  0x4f   : > { %s40_s10 = ssub.s32 %s963_s22, %s1452_s8  ;;  %s230_s11 = sand.u32 1, %s955_s20  }
  0x50   : > { %s1437_s6 = scalar_select %p1156_p12, 1, 0 }
  0x51   : > { %p43_p0 = scmp.eq.s32.totalorder %s40_s10, 0  ;;  %s628_s12 = sshll.u32 %s230_s11, 3 }
  0x52   : > { %s682_s13 = sshll.u32 %s963_s22, 7  ;;  %s1438_s0 = sld [smem:[#allocation18_spill]] }
  0x53   : > { %s1165_s14 = scalar_select %p43_p0, %s955_s20, %s45_s9  }
  0x54   : > { %s234_s27 = scalar_lea.vmem [#allocation2], %s628_s12  ;;  %p1174_p2 = pnand %p729_p7, %p54_p10 }
  0x55   : > { %s242_s24 = sshll.u32 %s234_s27, 4  ;;  %s1180_s7 = scalar_lea.sflag [#allocation3], %s230_s11  ;;  %s1178_s24 = int_to_ptr.vmem [resolvable:$true] %s242_s24 }
  0x56   : > { %p845_p13 = pneg %p1174_p2 }
  0x58   : > { %s1170_s17 = scalar_lea.hbm %s1438_s0, %s682_s13  ;;  %s848_s13 = scalar_lea.hbm %s1438_s0, 256 }
  0x59   : > { %s843_s9 = scalar_lea.hbm %s1170_s17, 128  ;;  %p849_p7 = scmp.lt.u32.totalorder %s1170_s17, %s1438_s0 }
  0x5a   : > { %p844_p11 = scmp.ne.s32.totalorder %s1170_s17, %s843_s9  ;;  %p850_p10 = scmp.lt.u32.totalorder %s848_s13, %s843_s9 }
  0x5b   : > { %p852_p9 = scmp.lt.u32.totalorder %s843_s9, %s1170_s17 }
  0x5c   : > { %p846_p3 = pnand %p845_p13, %p844_p11  ;;  %p851_p0 = por %p850_p10, %p849_p7 }
  0x5e   : > { %p847_p5 = pneg %p846_p3  ;;  %p853_p6 = por %p852_p9, %p851_p0 }
  0x60   : > { %p854_p12 = pnand %p853_p6, %p847_p5 }
  0x62   : > { %857 = shalt.err (!%p854_p12)
}
  0x63   : > { %s858_s11 = scalar_lea.vmem %s1178_s24, 128  ;;  %s973_s27 = smov [#allocation2]  }
  0x64   : > { %p859_p11 = scmp.ne.s32.totalorder %s1178_s24, %s858_s11  ;;  %s863_s10 = sshll.u32 %s973_s27, 4  ;;  %s864_s10 = int_to_ptr.vmem [resolvable:$false] %s863_s10 }
  0x65   : > { %s865_s12 = scalar_lea.vmem %s864_s10, 256  ;;  %p866_p4 = scmp.lt.s32.totalorder %s1178_s24, %s864_s10 }
  0x66   : > { %p861_p3 = pnand %p859_p11, %p845_p13  ;;  %p867_p7 = scmp.lt.s32.totalorder %s865_s12, %s858_s11 }
  0x68   : > { %p862_p1 = pneg %p861_p3  ;;  %p868_p10 = por %p867_p7, %p866_p4 }
  0x6a   : > { %p869_p9 = pnand %p868_p10, %p862_p1 }
  0x6c   : > { %872 = shalt.err (!%p869_p9)
}
  0x6d   : > { %s974_s9 = smov 32   ;;  %s975_s13 = smov 2  }
  0x6e   : > { %720 = dma.hbm_to_vmem [thread:$0]  (!%p1174_p2), %s1170_s17, 128, %s1178_s24, %s1180_s7, %s974_s9, %s974_s9, %s975_s13  }
  0x6f   : > { %254 = sbr.rel (%p1063_p8) target bundleno = 188 (0xbc), region = 40  ;;  %s1211_s15 = sand.u32 (!%p1063_p8), 1, %s951_s19  }
  0x70   : > { %s1427_s16 = sshll.u32 (!%p1063_p8), %s1211_s15, 3  ;;  %s257_s11 = scalar_lea.sflag (!%p1063_p8), [#allocation3], %s1211_s15 }
  0x71   : > { %s260_s27 = scalar_lea.vmem (!%p1063_p8), [#allocation2], %s1427_s16  ;;  %p1440_p1 = scmp.ne.s32.totalorder (!%p1063_p8), %s1432_s28, 0 }
  0x76   : > { %926 = dma.done.wait (%p1440_p1), %s257_s11, 128  }
  0x77   : > { %928 = vsyncadd (%p1440_p1), %s257_s11, 4294967168  ;;  %p1441_p4 = scmp.ne.s32.totalorder %s1430_s26, 0 }
  0x79   : > { %930 = dma.done.wait (%p1441_p4), [#allocation5], 64  }
  0x7a   : > { %932 = vsyncadd (%p1441_p4), [#allocation5], 4294967232 }
  0x7b   : > { %934 = dma.done.wait (%p1441_p4), [#allocation8], 80  }
  0x7c   : > { %936 = vsyncadd (%p1441_p4), [#allocation8], 4294967216 }
  0x7d   : > { %938 = dma.done.wait (%p1441_p4), [#allocation11], 16  }
  0x7e   : > { %940 = vsyncadd (%p1441_p4), [#allocation11], 4294967280 }
  0x7f   : > { %281 = sfence }
  0x80   : > { %s308_s28 = sld [smem:[#allocation6]]  ;;  %s638_s30 = sld [smem:[#allocation6 + $0x1]]  ;;  %v1235_v0 = vld [vmem:[%s260_s27] sm:$0x3]  ;;  %v1237_v1 = vld [vmem:[%s260_s27 + $0x2] sm:$0x3] }
  0x81   : > { %s639_s17 = sld [smem:[#allocation6 + $0x2]]  ;;  %s640_s24 = sld [smem:[#allocation6 + $0x3]]  ;;  %v1241_v2 = vld [vmem:[%s260_s27 + $0x4] sm:$0x3]  ;;  %v1247_v3 = vld [vmem:[%s260_s27 + $0x6] sm:$0x3] }
  0x82   : > { %s1233_s25 = sld [smem:[#allocation7]]  ;;  %s642_s10 = sld [smem:[#allocation6 + $0x81]] }
  0x83   : > { %s641_s7 = sld [smem:[#allocation6 + $0x80]]  ;;  %s643_s12 = sld [smem:[#allocation6 + $0x82]] }
  0x84   : > { %s1239_s9 = sld [smem:[#allocation6 + $0x83]]  ;;  %s1243_s26 = sld [smem:[#allocation7 + $0x1]] }
  0x85   : > { %s1245_s13 = sld [smem:[#allocation6 + $0x100]]  ;;  %s1249_s11 = sld [smem:[#allocation6 + $0x101]] }
  0x86   : > { %v309_v4 = vstv %s308_s28  ;;  %s1251_s16 = sld [smem:[#allocation6 + $0x102]]  ;;  %v312_v6 = vstv %s638_s30  ;;  %s1254_s0 = sld [smem:[#allocation6 + $0x103]] }
  0x87   : > { %v310_v5 = vmul.f32 %v309_v4, %v1235_v0  ;;  %v316_v7 = vstv %s639_s17  ;;  %v313_v8 = vmul.f32 %v312_v6, %v1237_v1  ;;  %v320_v10 = vstv %s640_s24  ;;  %s1258_s27 = sld [smem:[#allocation6 + $0x180]]  ;;  %s1260_s28 = sld [smem:[#allocation6 + $0x181]] }
  0x88   : > { %v317_v9 = vmul.f32 %v316_v7, %v1241_v2  ;;  %v321_v11 = vmul.f32 %v320_v10, %v1247_v3  ;;  %v332_v13 = vstv %s642_s10  ;;  %s1263_s30 = sld [smem:[#allocation6 + $0x182]]  ;;  %s1265_s17 = sld [smem:[#allocation6 + $0x183]]  ;;  %v324_v18 = vstv %s1233_s25 }
  0x89   : > { %v329_v12 = vstv %s641_s7  ;;  %v314_v14 = vadd.f32 %v313_v8, %v310_v5  ;;  %v333_v16 = vmul.f32 %v332_v13, %v1237_v1  ;;  %v336_v17 = vstv %s643_s12  ;;  %s1269_s24 = sld [smem:[#allocation7 + $0x2]]  ;;  %s1275_s7 = sld [smem:[#allocation7 + $0x3]] }
  0x8a   : > { %v330_v15 = vmul.f32 %v329_v12, %v1235_v0  ;;  %v337_v19 = vmul.f32 %v336_v17, %v1241_v2  ;;  %v340_v20 = vstv %s1239_s9  ;;  %s1277_s10 = sld [smem:[#allocation9]]  ;;  %s1281_s12 = sld [smem:[#allocation9 + $0x1]]  ;;  %v344_v26 = vstv %s1243_s26 }
  0x8b   : > { %v349_v21 = vstv %s1245_s13  ;;  %v318_v22 = vadd.f32 %v317_v9, %v314_v14  ;;  %v341_v24 = vmul.f32 %v340_v20, %v1247_v3  ;;  %v352_v27 = vstv %s1249_s11  ;;  %s1287_s25 = sld [smem:[#allocation9 + $0x2]]  ;;  %s1289_s9 = sld [smem:[#allocation9 + $0x80]] }
  0x8c   : > { %v334_v23 = vadd.f32 %v333_v16, %v330_v15  ;;  %v350_v25 = vmul.f32 %v349_v21, %v1235_v0  ;;  %v356_v28 = vstv %s1251_s16  ;;  %v360_v29 = vstv %s1254_s0  ;;  %s1293_s13 = sld [smem:[#allocation9 + $0x3]]  ;;  %s1295_s1 = sld [smem:[#allocation9 + $0x81]] }
  0x8d   : > { %v322_v30 = vadd.f32 %v321_v11, %v318_v22  ;;  %v353_v32 = vmul.f32 %v352_v27, %v1237_v1  ;;  %v357_v33 = vmul.f32 %v356_v28, %v1241_v2  ;;  %v361_v34 = vmul.f32 %v360_v29, %v1247_v3  ;;  %s1301_s0 = sld [smem:[#allocation10]]  ;;  %s1303_s16 = sld [smem:[#allocation9 + $0x82]] }
  0x8e   : > { %v338_v31 = vadd.f32 %v337_v19, %v334_v23  ;;  %v369_v35 = vstv %s1258_s27  ;;  %v372_v36 = vstv %s1260_s28  ;;  %v376_v37 = vstv %s1263_s30  ;;  %s1306_s26 = sld [smem:[#allocation9 + $0x100]]  ;;  %s1311_s11 = sld [smem:[#allocation9 + $0x101]] }
  0x8f   : > { %v325_v38 = vadd.f32 %v324_v18, %v322_v30  ;;  %v354_v40 = vadd.f32 %v353_v32, %v350_v25  ;;  %v370_v41 = vmul.f32 %v369_v35, %v1235_v0  ;;  %v373_v42 = vmul.f32 %v372_v36, %v1237_v1  ;;  %s1313_s27 = sld [smem:[#allocation9 + $0x102]]  ;;  %s1316_s28 = sld [smem:[#allocation9 + $0x83]] }
  0x90   : > { %v342_v39 = vadd.f32 %v341_v24, %v338_v31  ;;  %v377_v43 = vmul.f32 %v376_v37, %v1241_v2  ;;  %v380_v44 = vstv %s1265_s17  ;;  %v364_v48 = vstv %s1269_s24  ;;  %s1321_s30 = sld [smem:[#allocation9 + $0x103]]  ;;  %s1323_s17 = sld [smem:[#allocation9 + $0x180]] }
  0x91   : > { %v326_v45 = vmax.f32 %v325_v38, 0.0  ;;  %v358_v47 = vadd.f32 %v357_v33, %v354_v40  ;;  %v374_v49 = vadd.f32 %v373_v42, %v370_v41  ;;  %v381_v50 = vmul.f32 %v380_v44, %v1247_v3  ;;  %s1329_s24 = sld [smem:[#allocation9 + $0x181]]  ;;  %p1443_p8 = scmp.ne.s32.totalorder %s1437_s6, 0 }
  0x92   : > { %v345_v46 = vadd.f32 %v344_v26, %v342_v39  ;;  %v384_v51 = vstv %s1275_s7  ;;  %v389_v52 = vstv %s1277_s10  ;;  %v392_v56 = vstv %s1281_s12  ;;  %s1331_s7 = sld [smem:[#allocation9 + $0x182]]  ;;  %s1336_s10 = sld [smem:[#allocation10 + $0x1]] }
  0x93   : > { %v327_v53 = vmin.f32 %v326_v45, 6.0  ;;  %v362_v55 = vadd.f32 %v361_v34, %v358_v47  ;;  %v378_v57 = vadd.f32 %v377_v43, %v374_v49  ;;  %v396_v58 = vstv %s1287_s25  ;;  %s1341_s12 = sld [smem:[#allocation9 + $0x183]] }
  0x94   : > { %v346_v54 = vmax.f32 %v345_v46, 0.0  ;;  %v411_v59 = vstv %s1289_s9  ;;  %v414_v60 = vstv %s1295_s1  ;;  %v400_v6 = vstv %s1293_s13  ;;  %s1339_s1 = sld [smem:[#allocation10 + $0x2]]  ;;  %s1348_s25 = sld [smem:[#allocation10 + $0x3]] }
  0x95   : > { %v365_v62 = vadd.f32 %v364_v48, %v362_v55  ;;  %v390_v63 = vmul.f32 %v389_v52, %v327_v53  ;;  %v412_v4 = vmul.f32 %v411_v59, %v327_v53  ;;  %v382_v5 = vadd.f32 %v381_v50, %v378_v57  ;;  %s1442_s9 = sshll.u32 %s1211_s15, 3 }
  0x96   : > { %v347_v61 = vmin.f32 %v346_v54, 6.0  ;;  %v404_v7 = vstv %s1301_s0  ;;  %v418_v8 = vstv %s1303_s16  ;;  %v434_v12 = vstv %s1306_s26  ;;  %s303_s13 = scalar_lea.vmem [#allocation12], %s1442_s9  ;;  %s683_s16 = sshll.u32 %s959_s21, 7 }
  0x97   : > { %v366_v9 = vmax.f32 %v365_v62, 0.0  ;;  %v385_v13 = vadd.f32 %v384_v51, %v382_v5  ;;  %v435_v14 = vmul.f32 %v434_v12, %v327_v53  ;;  %v437_v15 = vstv %s1311_s11  ;;  %s494_s0 = sshll.u32 %s303_s13, 4  ;;  %s480_s21 = scalar_lea.sflag [#allocation4], %s1211_s15  ;;  %s1363_s0 = int_to_ptr.vmem [resolvable:$true] %s494_s0 }
  0x98   : > { %v393_v10 = vmul.f32 %v392_v56, %v347_v61  ;;  %v415_v11 = vmul.f32 %v414_v60, %v347_v61  ;;  %v441_v16 = vstv %s1313_s27  ;;  %v438_v20 = vmul.f32 %v437_v15, %v347_v61  ;;  %s1368_s27 = scalar_lea.hbm %s1422_s5, %s683_s16 }
  0x99   : > { %v367_v17 = vmin.f32 %v366_v9, 6.0  ;;  %v386_v21 = vmax.f32 %v385_v13, 0.0  ;;  %v422_v22 = vstv %s1316_s28  ;;  %v445_v23 = vstv %s1321_s30  ;;  %s873_s28 = scalar_lea.vmem %s1363_s0, 128  ;;  %s976_s30 = smov [#allocation12]  }
  0x9a   : > { %v394_v18 = vadd.f32 %v393_v10, %v390_v63  ;;  %v416_v19 = vadd.f32 %v415_v11, %v412_v4  ;;  %v457_v24 = vstv %s1323_s17  ;;  %v439_v27 = vadd.f32 %v438_v20, %v435_v14  ;;  %p874_p6 = scmp.ne.s32.totalorder %s1363_s0, %s873_s28  ;;  %s877_s17 = sshll.u32 %s976_s30, 4  ;;  %s878_s17 = int_to_ptr.vmem [resolvable:$false] %s877_s17 }
  0x9b   : > { %v397_v25 = vmul.f32 %v396_v58, %v367_v17  ;;  %v419_v26 = vmul.f32 %v418_v8, %v367_v17  ;;  %v442_v28 = vmul.f32 %v441_v16, %v367_v17  ;;  %v387_v29 = vmin.f32 %v386_v21, 6.0  ;;  %p880_p13 = scmp.lt.s32.totalorder %s1363_s0, %s878_s17 }
  0x9c   : > { %v458_v30 = vmul.f32 %v457_v24, %v327_v53  ;;  %v460_v31 = vstv %s1329_s24  ;;  %v464_v32 = vstv %s1331_s7  ;;  %v426_v41 = vstv %s1336_s10  ;;  %p875_p12 = pnand %p874_p6, %p1443_p8  ;;  %s879_s24 = scalar_lea.vmem %s878_s17, 256 }
  0x9d   : > { %v398_v33 = vadd.f32 %v397_v25, %v394_v18  ;;  %v420_v34 = vadd.f32 %v419_v26, %v416_v19  ;;  %v443_v35 = vadd.f32 %v442_v28, %v439_v27  ;;  %v461_v36 = vmul.f32 %v460_v31, %v347_v61  ;;  %p881_p5 = scmp.lt.s32.totalorder %s879_s24, %s873_s28 }
  0x9e   : > { %v401_v37 = vmul.f32 %v400_v6, %v387_v29  ;;  %v423_v38 = vmul.f32 %v422_v22, %v387_v29  ;;  %v446_v39 = vmul.f32 %v445_v23, %v387_v29  ;;  %v465_v40 = vmul.f32 %v464_v32, %v367_v17  ;;  %p876_p2 = pneg %p875_p12 }
  0x9f   : > { %v449_v42 = vstv %s1339_s1  ;;  %v462_v43 = vadd.f32 %v461_v36, %v458_v30  ;;  %v468_v44 = vstv %s1341_s12  ;;  %v472_v53 = vstv %s1348_s25  ;;  %p882_p0 = por %p881_p5, %p880_p13 }
  0xa0   : > { %v402_v45 = vadd.f32 %v401_v37, %v398_v33  ;;  %v424_v46 = vadd.f32 %v423_v38, %v420_v34  ;;  %v447_v47 = vadd.f32 %v446_v39, %v443_v35  ;;  %v469_v48 = vmul.f32 %v468_v44, %v387_v29 }
  0xa1   : > { %v466_v49 = vadd.f32 %v465_v40, %v462_v43  ;;  %p883_p11 = pnand %p882_p0, %p876_p2 }
  0xa2   : > { %v405_v50 = vadd.f32 %v404_v7, %v402_v45  ;;  %v427_v51 = vadd.f32 %v426_v41, %v424_v46  ;;  %v450_v52 = vadd.f32 %v449_v42, %v447_v47 }
  0xa3   : > { %v470_v54 = vadd.f32 %v469_v48, %v466_v49 }
  0xa4   : > { %v406_v55 = vadd.f32 %v405_v50, %v1235_v0  ;;  %v428_v56 = vadd.f32 %v427_v51, %v1237_v1  ;;  %v451_v57 = vadd.f32 %v450_v52, %v1241_v2 }
  0xa5   : > { %v473_v58 = vadd.f32 %v472_v53, %v470_v54 }
  0xa6   : > { %v407_v59 = vmax.f32 %v406_v55, 0.0  ;;  %v429_v60 = vmax.f32 %v428_v56, 0.0  ;;  %v452_v61 = vmax.f32 %v451_v57, 0.0 }
  0xa7   : > { %v474_v62 = vadd.f32 %v473_v58, %v1247_v3 }
  0xa8   : > { %v408_v63 = vmin.f32 %v407_v59, 6.0  ;;  %v430_v4 = vmin.f32 %v429_v60, 6.0  ;;  %v453_v5 = vmin.f32 %v452_v61, 6.0 }
  0xa9   : > { %v475_v0 = vmax.f32 %v474_v62, 0.0 }
  0xaa   : > { %409 = vst [vmem:[%s303_s13] sm:$0x3] %v408_v63  ;;  %664 = vst [vmem:[%s303_s13 + $0x2] sm:$0x3] %v430_v4 }
  0xab   : > { %670 = vst [vmem:[%s303_s13 + $0x4] sm:$0x3] %v453_v5  ;;  %v476_v1 = vmin.f32 %v475_v0, 6.0 }
  0xad   : > { %676 = vst [vmem:[%s303_s13 + $0x6] sm:$0x3] %v476_v1 }
  0xae   : > { %886 = shalt.err (!%p883_p11)
}
  0xaf   : > { %s887_s7 = scalar_lea.hbm %s1368_s27, 128  ;;  %s891_s12 = scalar_lea.hbm %s1422_s5, 256 }
  0xb0   : > { %p888_p3 = scmp.ne.s32.totalorder %s1368_s27, %s887_s7  ;;  %p892_p9 = scmp.lt.u32.totalorder %s1368_s27, %s1422_s5 }
  0xb1   : > { %p893_p1 = scmp.lt.u32.totalorder %s891_s12, %s887_s7  ;;  %p895_p6 = scmp.lt.u32.totalorder %s887_s7, %s1368_s27 }
  0xb2   : > { %p889_p7 = pnand %p888_p3, %p1443_p8 }
  0xb3   : > { %p894_p4 = por %p893_p1, %p892_p9 }
  0xb4   : > { %p890_p10 = pneg %p889_p7 }
  0xb5   : > { %p896_p12 = por %p895_p6, %p894_p4 }
  0xb7   : > { %p897_p2 = pnand %p896_p12, %p890_p10 }
  0xb9   : > { %900 = shalt.err (!%p897_p2)
}
  0xba   : > { %s977_s13 = smov 32   ;;  %s978_s16 = smov 2  }
  0xbb   : > { %702 = dma.vmem_to_hbm [thread:$0]  (%p1443_p8), %s1363_s0, 128, %s1368_s27, %s480_s21, %s977_s13, %s977_s13, %s978_s16  }
  0xbc PF: > { %s509_s26 = sand.u32 1, %s947_s18   ;;  %p1444_p13 = scmp.ne.s32.totalorder %s1433_s29, 0 }
  0xbd   : > { %p1445_p5 = scmp.ge.s32.totalorder %s967_s23, 2  ;;  %s510_s11 = scalar_lea.sflag [#allocation4], %s509_s26 }
  0xbf   : > { %p722_p0 = pnand %p1445_p5, %p1444_p13 }
  0xc1   : > { %942 = dma.done.wait (!%p722_p0), %s510_s11, 128  }
  0xc2   : > { %944 = vsyncadd (!%p722_p0), %s510_s11, 4294967168  ;;  %s24_s23 = sadd.s32 1, %s967_s23   ;;  %s1446_s18 = smov %s951_s19 }
  0xc3   : > { %p21_p11 = scmp.ge.s32.totalorder %s24_s23, 4   ;;  %s1447_s19 = smov %s955_s20 }
  0xc4   : > { %s1448_s20 = smov %s1165_s14  ;;  %s1449_s21 = smov %s963_s22 }
  0xc5   : > { %s1450_s22 = smov %s1452_s8  ;;  %23 = sbr.rel (!%p21_p11) target bundleno = 12 (0xc), region = 105 }
  0xcc   :  { %515 = vsyncpa [#allocation3], 1 }
  0xcd   :  { %517 = vsyncpa [#allocation3 + $0x1], 1 }
  0xce   :  { %518 = vsyncpa [#allocation4], 1 }
  0xcf   :  { %520 = vsyncpa [#allocation4 + $0x1], 1 }
  0xd0   :  { %521 = vsyncpa [#allocation5], 1 }
  0xd1   :  { %523 = vsyncpa [#allocation5 + $0x1], 1 }
  0xd2   :  { %524 = vsyncpa [#allocation8], 1 }
  0xd3   :  { %525 = vsyncpa [#allocation11], 1 }

</bundles_post_ra>
